<compile_context>
chip_gen: v6e
topology: v6e:2x2x1
jax: 0.10.0
libtpu: 0.0.40
codegen_flags: <defaults>
</compile_context>

<pallas_src>
import numpy as np
import jax
import jax.numpy as jnp
from jax.experimental import pallas as pl
from jax.experimental.pallas import tpu as pltpu


# ---------------------------------------------------------------------------
# Kernel
# ---------------------------------------------------------------------------
def embed_nd_kernel(ids_ref, omega_ref, sc_ref, ss_ref, out_ref):
    # ids_ref  : (1, A8, tn)   f32   positions, one (zero-padded) row per axis
    # omega_ref: (n_axes, K)   f32   row a = omega for axis a's slots, 0 elsewhere
    # sc_ref   : (K, 4K)       bf16  selection: cos -> lanes 4k and 4k+3
    # ss_ref   : (K, 4K)       bf16  selection: -sin -> lane 4k+1, +sin -> 4k+2
    # out_ref  : (1, tn, 4K)   f32   interleaved [cos, -sin, sin, cos] per k
    n_axes, _ = omega_ref.shape

    # Small (8, tn) -> (tn, 8) transpose; ids arrive lane-dense from HBM.
    ids_nt = jnp.transpose(ids_ref[0])                     # (tn, A8)
    omega = omega_ref[...]                                 # (n_axes, K)

    # angles[n, k] = ids[n, axis_of(k)] * omega_full[k]  (exactly one non-zero
    # term per slot k) -> unrolled f32 broadcast-MAC on the VPU, bit-identical
    # rounding to the reference's pos[..., None] * omega.
    ang = ids_nt[:, 0:1] * omega[0:1, :]                   # (tn, K)
    for a in range(1, n_axes):
        ang = ang + ids_nt[:, a:a + 1] * omega[a:a + 1, :]

    c = jnp.cos(ang)                                       # (tn, K)
    s = jnp.sin(ang)                                       # (tn, K)

    # Exact bf16 hi/lo split so the MXU interleave is precise (<~4e-6 abs err)
    # with plain bf16 matmuls: each output element is +/- one input element.
    f32, bf16 = jnp.float32, jnp.bfloat16
    c_hi = c.astype(bf16)
    c_lo = (c - c_hi.astype(f32)).astype(bf16)
    s_hi = s.astype(bf16)
    s_lo = (s - s_hi.astype(f32)).astype(bf16)

    sc = sc_ref[...]
    ss = ss_ref[...]
    out = jnp.dot(c_hi, sc, preferred_element_type=f32)
    out = out + jnp.dot(c_lo, sc, preferred_element_type=f32)
    out = out + jnp.dot(s_hi, ss, preferred_element_type=f32)
    out = out + jnp.dot(s_lo, ss, preferred_element_type=f32)

    # Single unmasked, lane-dense store of the already-final layout.
    out_ref[0] = out


# ---------------------------------------------------------------------------
# Host-side constant tables
# ---------------------------------------------------------------------------
def _build_omega_selector(axes_dim, theta):
    """(n_axes, K) f32 table: row a holds omega for axis a's slots, 0 elsewhere."""
    n_axes = len(axes_dim)
    K = sum(axes_dim) // 2
    sel = np.zeros((n_axes, K), dtype=np.float64)
    off = 0
    for a, d in enumerate(axes_dim):
        scale = np.arange(0, d, 2, dtype=np.float64) / d      # float64, like torch
        sel[a, off:off + d // 2] = 1.0 / (theta ** scale)
        off += d // 2
    return jnp.asarray(sel, dtype=jnp.float32)


def _build_interleave_mats(K):
    """0/±1 selection matrices mapping [c | s] -> interleaved [c, -s, s, c]."""
    sc = np.zeros((K, 4 * K), dtype=np.float32)
    ss = np.zeros((K, 4 * K), dtype=np.float32)
    k = np.arange(K)
    sc[k, 4 * k + 0] = 1.0
    sc[k, 4 * k + 3] = 1.0
    ss[k, 4 * k + 1] = -1.0
    ss[k, 4 * k + 2] = 1.0
    return jnp.asarray(sc, jnp.bfloat16), jnp.asarray(ss, jnp.bfloat16)


def _pick_tile_n(N, B, max_tile=2048):
    """Sequence tile: large (low per-step overhead), multiple of 128, and
    >= 2 tiles when B == 1 so both v7x TensorCores get work."""
    if N < 256:
        return N                         # single full-extent block
    min_steps = 2 if B == 1 else 1
    n_steps = max(min_steps, -(-N // max_tile))
    tn = -(-N // n_steps)
    tn = ((tn + 127) // 128) * 128
    return min(tn, max_tile)


# ---------------------------------------------------------------------------
# Wrapper
# ---------------------------------------------------------------------------
def embed_nd_pallas(ids, theta, axes_dim):
    """ids: (B, N, n_axes) -> (B, 1, N, sum(axes_dim)//2, 2, 2) float32."""
    B, N, n_axes = ids.shape
    assert len(axes_dim) == n_axes
    assert all(d % 2 == 0 for d in axes_dim)
    K = sum(axes_dim) // 2

    omega_sel = _build_omega_selector(axes_dim, theta)        # (n_axes, K) f32
    s_cos, s_sin = _build_interleave_mats(K)                  # (K, 4K) bf16

    # TODO(synk): exact-integer check for ids > 2**24 skipped (traced values).
    # Pre-transpose ids to (B, A8, N): axis rows are contiguous tn*4-byte DMA
    # rows per tile (axes padded to 8 sublanes; padded rows are zero/unused).
    A8 = ((n_axes + 7) // 8) * 8
    ids_t = jnp.transpose(ids.astype(jnp.float32), (0, 2, 1))  # (B, n_axes, N)
    if A8 > n_axes:
        ids_t = jnp.pad(ids_t, ((0, 0), (0, A8 - n_axes), (0, 0)))

    tn = _pick_tile_n(N, B)
    n_tiles = pl.cdiv(N, tn)

    cost = pl.CostEstimate(
        flops=int(B * N * K * (32 * K + 2 * n_axes)),
        transcendentals=int(2 * B * N * K),
        bytes_accessed=int(4 * B * N * 4 * K + 4 * B * A8 * N),
    )

    flat = pl.pallas_call(
        embed_nd_kernel,
        out_shape=jax.ShapeDtypeStruct((B, N, 4 * K), jnp.float32),
        grid_spec=pltpu.PrefetchScalarGridSpec(
            num_scalar_prefetch=0,
            grid=(B, n_tiles),
            in_specs=[
                pl.BlockSpec((1, A8, tn), lambda b, t: (b, 0, t)),      # ids
                pl.BlockSpec((n_axes, K), lambda b, t: (0, 0)),          # omega
                pl.BlockSpec((K, 4 * K), lambda b, t: (0, 0)),           # S_cos
                pl.BlockSpec((K, 4 * K), lambda b, t: (0, 0)),           # S_sin
            ],
            out_specs=pl.BlockSpec((1, tn, 4 * K), lambda b, t: (b, t, 0)),
        ),
        compiler_params=pltpu.CompilerParams(
            dimension_semantics=("parallel", "parallel")),
        cost_estimate=cost,
    )(ids_t, omega_sel, s_cos, s_sin)

    # Metadata-only layout: (B, N, 4K) -> (B, 1, N, K, 2, 2).  The kernel
    # already wrote the interleaved [cos, -sin, sin, cos] order, so this
    # reshape is contiguous (no transpose, no extra HBM pass).
    return flat.reshape(B, N, K, 2, 2)[:, None]


# ---------------------------------------------------------------------------
# Pure-JAX reference matching the PyTorch forward.
# ---------------------------------------------------------------------------
def _rope_ref(pos, dim, theta):
    scale = np.arange(0, dim, 2, dtype=np.float64) / dim
    omega = jnp.asarray(1.0 / (theta ** scale), dtype=jnp.float32)    # (dim/2,)
    ang = pos[..., None].astype(jnp.float32) * omega                  # (..., N, dim/2)
    out = jnp.stack([jnp.cos(ang), -jnp.sin(ang), jnp.sin(ang), jnp.cos(ang)],
                    axis=-1)
    return out.reshape(*out.shape[:-1], 2, 2)


def embed_nd_ref(ids, theta, axes_dim):
    n_axes = ids.shape[-1]
    emb = jnp.concatenate(
        [_rope_ref(ids[..., i], axes_dim[i], theta) for i in range(n_axes)],
        axis=-3)
    return emb[:, None]


if __name__ == "__main__":
    theta = 10_000
    axes_dim = [8, 12, 12]            # sum = 32 (real Flux: dim=128, [16, 56, 56])
    n_axes = len(axes_dim)
    K = sum(axes_dim) // 2

    key = jax.random.PRNGKey(0)
    k1, k2 = jax.random.split(key)

    # Case 1: small shapes (single block per batch element).
    B, N = 2, 8
    ids = jax.random.randint(k1, (B, N, n_axes), 0, 32).astype(jnp.float32)
    out = jax.block_until_ready(embed_nd_pallas(ids, theta, axes_dim))
    ref = embed_nd_ref(ids, theta, axes_dim)
    assert out.shape == (B, 1, N, K, 2, 2), out.shape
    assert jnp.allclose(out, ref, atol=1e-4, rtol=1e-4), \
        float(jnp.max(jnp.abs(out - ref)))

    # Case 2: exercises the tiled path (B=1, multiple sequence tiles, both
    # grid axes parallel -> both v7x TensorCores get work).
    B2, N2 = 1, 512
    ids2 = jax.random.randint(k2, (B2, N2, n_axes), 0, 1024).astype(jnp.float32)
    out2 = jax.block_until_ready(embed_nd_pallas(ids2, theta, axes_dim))
    ref2 = embed_nd_ref(ids2, theta, axes_dim)
    assert out2.shape == (B2, 1, N2, K, 2, 2), out2.shape
    assert jnp.allclose(out2, ref2, atol=1e-4, rtol=1e-4), \
        float(jnp.max(jnp.abs(out2 - ref2)))

    print("KERNEL_OK")
</pallas_src>

<mosaic_0001>
module attributes {stable_mosaic.version = 11 : i64} {
  func.func @embed_nd_kernel(%arg0: i32, %arg1: i32, %arg2: memref<1x8x8xf32, #tpu.memory_space<vmem>>, %arg3: memref<3x16xf32, #tpu.memory_space<vmem>>, %arg4: memref<16x64xbf16, #tpu.memory_space<vmem>>, %arg5: memref<16x64xbf16, #tpu.memory_space<vmem>>, %arg6: memref<1x8x64xf32, #tpu.memory_space<vmem>>) attributes {dimension_semantics = [#tpu.dimension_semantics<parallel>, #tpu.dimension_semantics<parallel>], iteration_bounds = array<i64: 2, 1>, scalar_prefetch = 0 : i64, scratch_operands = 0 : i64, tpu.core_type = #tpu.core_type<tc>, window_params = [{transform_indices = @transform_0, window_bounds = array<i64: 1, 8, 8>}, {pipeline_mode = #tpu.pipeline_mode<synchronous>, transform_indices = @transform_1, window_bounds = array<i64: 3, 16>}, {pipeline_mode = #tpu.pipeline_mode<synchronous>, transform_indices = @transform_2, window_bounds = array<i64: 16, 64>}, {pipeline_mode = #tpu.pipeline_mode<synchronous>, transform_indices = @transform_3, window_bounds = array<i64: 16, 64>}, {transform_indices = @transform_4, window_bounds = array<i64: 1, 8, 64>}]} {
    %c0 = arith.constant 0 : index
    %c0_0 = arith.constant 0 : index
    %c0_1 = arith.constant 0 : index
    %0 = vector.load %arg2[%c0, %c0_0, %c0_1] : memref<1x8x8xf32, #tpu.memory_space<vmem>>, vector<1x8x8xf32>
    %1 = vector.shape_cast %0 : vector<1x8x8xf32> to vector<8x8xf32>
    %2 = tpu.transpose %1, [1, 0] : vector<8x8xf32> -> vector<8x8xf32>
    %c0_2 = arith.constant 0 : index
    %c0_3 = arith.constant 0 : index
    %3 = vector.load %arg3[%c0_2, %c0_3] : memref<3x16xf32, #tpu.memory_space<vmem>>, vector<3x16xf32>
    %4 = vector.extract_strided_slice %2 {offsets = [0, 0], sizes = [8, 1], strides = [1, 1]} : vector<8x8xf32> to vector<8x1xf32>
    %5 = vector.extract_strided_slice %3 {offsets = [0, 0], sizes = [1, 16], strides = [1, 1]} : vector<3x16xf32> to vector<1x16xf32>
    %6 = vector.broadcast %4 : vector<8x1xf32> to vector<8x16xf32>
    %7 = vector.broadcast %5 : vector<1x16xf32> to vector<8x16xf32>
    %8 = arith.mulf %6, %7 : vector<8x16xf32>
    %9 = vector.extract_strided_slice %2 {offsets = [0, 1], sizes = [8, 1], strides = [1, 1]} : vector<8x8xf32> to vector<8x1xf32>
    %10 = vector.extract_strided_slice %3 {offsets = [1, 0], sizes = [1, 16], strides = [1, 1]} : vector<3x16xf32> to vector<1x16xf32>
    %11 = vector.broadcast %9 : vector<8x1xf32> to vector<8x16xf32>
    %12 = vector.broadcast %10 : vector<1x16xf32> to vector<8x16xf32>
    %13 = arith.mulf %11, %12 : vector<8x16xf32>
    %14 = arith.addf %8, %13 : vector<8x16xf32>
    %15 = vector.extract_strided_slice %2 {offsets = [0, 2], sizes = [8, 1], strides = [1, 1]} : vector<8x8xf32> to vector<8x1xf32>
    %16 = vector.extract_strided_slice %3 {offsets = [2, 0], sizes = [1, 16], strides = [1, 1]} : vector<3x16xf32> to vector<1x16xf32>
    %17 = vector.broadcast %15 : vector<8x1xf32> to vector<8x16xf32>
    %18 = vector.broadcast %16 : vector<1x16xf32> to vector<8x16xf32>
    %19 = arith.mulf %17, %18 : vector<8x16xf32>
    %20 = arith.addf %14, %19 : vector<8x16xf32>
    %21 = math.cos %20 : vector<8x16xf32>
    %22 = math.sin %20 : vector<8x16xf32>
    %23 = arith.truncf %21 : vector<8x16xf32> to vector<8x16xbf16>
    %24 = arith.extf %23 : vector<8x16xbf16> to vector<8x16xf32>
    %25 = arith.subf %21, %24 : vector<8x16xf32>
    %26 = arith.truncf %25 : vector<8x16xf32> to vector<8x16xbf16>
    %27 = arith.truncf %22 : vector<8x16xf32> to vector<8x16xbf16>
    %28 = arith.extf %27 : vector<8x16xbf16> to vector<8x16xf32>
    %29 = arith.subf %22, %28 : vector<8x16xf32>
    %30 = arith.truncf %29 : vector<8x16xf32> to vector<8x16xbf16>
    %c0_4 = arith.constant 0 : index
    %c0_5 = arith.constant 0 : index
    %31 = vector.load %arg4[%c0_4, %c0_5] : memref<16x64xbf16, #tpu.memory_space<vmem>>, vector<16x64xbf16>
    %c0_6 = arith.constant 0 : index
    %c0_7 = arith.constant 0 : index
    %32 = vector.load %arg5[%c0_6, %c0_7] : memref<16x64xbf16, #tpu.memory_space<vmem>>, vector<16x64xbf16>
    %cst = arith.constant dense<0.000000e+00> : vector<8x64xf32>
    %33 = tpu.matmul %23, %31, %cst {dimension_numbers = #tpu.dot_dimension_numbers<[1], [0], [0], [1], [0, 0, 1, 1], [], []>} : vector<8x16xbf16>, vector<16x64xbf16>, vector<8x64xf32> -> vector<8x64xf32>
    %cst_8 = arith.constant dense<0.000000e+00> : vector<8x64xf32>
    %34 = tpu.matmul %26, %31, %cst_8 {dimension_numbers = #tpu.dot_dimension_numbers<[1], [0], [0], [1], [0, 0, 1, 1], [], []>} : vector<8x16xbf16>, vector<16x64xbf16>, vector<8x64xf32> -> vector<8x64xf32>
    %35 = arith.addf %33, %34 : vector<8x64xf32>
    %cst_9 = arith.constant dense<0.000000e+00> : vector<8x64xf32>
    %36 = tpu.matmul %27, %32, %cst_9 {dimension_numbers = #tpu.dot_dimension_numbers<[1], [0], [0], [1], [0, 0, 1, 1], [], []>} : vector<8x16xbf16>, vector<16x64xbf16>, vector<8x64xf32> -> vector<8x64xf32>
    %37 = arith.addf %35, %36 : vector<8x64xf32>
    %cst_10 = arith.constant dense<0.000000e+00> : vector<8x64xf32>
    %38 = tpu.matmul %30, %32, %cst_10 {dimension_numbers = #tpu.dot_dimension_numbers<[1], [0], [0], [1], [0, 0, 1, 1], [], []>} : vector<8x16xbf16>, vector<16x64xbf16>, vector<8x64xf32> -> vector<8x64xf32>
    %39 = arith.addf %37, %38 : vector<8x64xf32>
    %c0_11 = arith.constant 0 : index
    %c0_12 = arith.constant 0 : index
    %c0_13 = arith.constant 0 : index
    %40 = vector.load %arg6[%c0_11, %c0_12, %c0_13] : memref<1x8x64xf32, #tpu.memory_space<vmem>>, vector<1x8x64xf32>
    %41 = vector.shape_cast %40 : vector<1x8x64xf32> to vector<8x64xf32>
    %42 = vector.shape_cast %39 : vector<8x64xf32> to vector<1x8x64xf32>
    tpu.vector_store %arg6[%c0_11, %c0_12, %c0_13], %42 {strides = array<i32>} : memref<1x8x64xf32, #tpu.memory_space<vmem>>, vector<1x8x64xf32>,
    return
  }
  func.func @transform_0(%arg0: i32, %arg1: i32) -> (i32, i32, i32) {
    %c0_i32 = arith.constant 0 : i32
    %c0_i32_0 = arith.constant 0 : i32
    return %arg0, %c0_i32, %arg1 : i32, i32, i32
  }
  func.func @transform_1(%arg0: i32, %arg1: i32) -> (i32, i32) {
    %c0_i32 = arith.constant 0 : i32
    %c0_i32_0 = arith.constant 0 : i32
    %c0_i32_1 = arith.constant 0 : i32
    return %c0_i32, %c0_i32_0 : i32, i32
  }
  func.func @transform_2(%arg0: i32, %arg1: i32) -> (i32, i32) {
    %c0_i32 = arith.constant 0 : i32
    %c0_i32_0 = arith.constant 0 : i32
    %c0_i32_1 = arith.constant 0 : i32
    return %c0_i32, %c0_i32_0 : i32, i32
  }
  func.func @transform_3(%arg0: i32, %arg1: i32) -> (i32, i32) {
    %c0_i32 = arith.constant 0 : i32
    %c0_i32_0 = arith.constant 0 : i32
    %c0_i32_1 = arith.constant 0 : i32
    return %c0_i32, %c0_i32_0 : i32, i32
  }
  func.func @transform_4(%arg0: i32, %arg1: i32) -> (i32, i32, i32) {
    %c0_i32 = arith.constant 0 : i32
    %c0_i32_0 = arith.constant 0 : i32
    return %arg0, %arg1, %c0_i32 : i32, i32, i32
  }
}

</mosaic_0001>

<bundles_post_ra>
// kernel: tpu_custom_call.1
= control target key start
LH: loop header
LB: loop body
LE: loop exit
PB: predicated region body
PF: predicated region fallthrough
CT: control target
= control target key end

     0   :  { %9 = vsyncpa [#allocation3], 0  ;;  %s1532_s0 = inlined_call_operand.hbm [shape: f32[2,8,8], index: 0, kind: input, shape index: {}]   ;;  %s1533_s1 = inlined_call_operand.hbm [shape: f32[3,16], index: 1, kind: input, shape index: {}]   ;;  %s1534_s2 = inlined_call_operand.hbm [shape: bf16[16,64], index: 2, kind: input, shape index: {}]   ;;  %s1535_s3 = inlined_call_operand.hbm [shape: bf16[16,64], index: 3, kind: input, shape index: {}]   ;;  %s1536_s4 = inlined_call_operand.hbm [shape: f32[2,8,64], index: 4, kind: output, shape index: {}]  }
   0x1   :  { %11 = vsyncpa [#allocation3 + $0x1], 0 }
   0x2   :  { %12 = vsyncpa [#allocation6], 0 }
   0x3   :  { %13 = vsyncpa [#allocation9], 0 }
   0x4   :  { %14 = vsyncpa [#allocation4], 0 }
   0x5   :  { %16 = vsyncpa [#allocation4 + $0x1], 0  ;;  %s1293_s15 = smov 0   ;;  %s1295_s16 = smov 0  }
   0x6   :  { %s1297_s17 = smov 0   ;;  %s1299_s18 = smov 0  }
   0x7   :  { %s1301_s19 = smov 0   ;;  %s1303_s20 = smov 0  }
   0x8 LB: > { %s869_s21 = sadd.s32 4294967295, %s1248_s20   ;;  %s870_s22 = sadd.s32 4294967294, %s1248_s20   ;;  %s1248_s20 = sphi %s1303_s20, %s22_s20   ;;  %s1244_s19 = sphi %s1301_s19, %s1559_s19   ;;  %s1240_s18 = sphi %s1299_s18, %s1558_s18   ;;  %s1236_s17 = sphi %s1297_s17, %s1557_s17   ;;  %s1232_s16 = sphi %s1295_s16, %s1556_s16   ;;  %s1228_s15 = sphi %s1293_s15, %s1555_s15  }
   0x9   : > { %p56_p0 = scmp.ne.s32.totalorder %s1232_s16, %s1228_s15  ;;  %p1327_p1 = scmp.eq.s32.totalorder %s869_s21, 0 }
   0xa   : > { %p1331_p2 = scmp.eq.s32.totalorder %s869_s21, 1  ;;  %p151_p3 = scmp.eq.s32.totalorder %s870_s22, 1 }
   0xb   : > { %s1541_s23 = scalar_select %p1327_p1, 1, 0 }
   0xc   : > { %s1542_s24 = scalar_select %p1331_p2, 1, 0 }
   0xd   : > { %p1337_p4 = por %p1327_p1, %p56_p0  ;;  %p871_p5 = scmp.ge.s32.totalorder %s1248_s20, 1 }
   0xe   : > { %p1342_p6 = por %p151_p3, %p56_p0  ;;  %p158_p7 = scmp.lt.s32.totalorder %s1248_s20, 3 }
   0xf   : > { %s1543_s25 = scalar_select %p1337_p4, 1, 0 }
  0x10   : > { %s1544_s26 = scalar_select %p1342_p6, 1, 0 }
  0x11   : > { %p1347_p8 = pnand %p871_p5, %p158_p7  ;;  %s1250_s28 = smov [#allocation5]  }
  0x12   : > { %s171_s29 = sshll.u32 %s1250_s28, 4  ;;  %s1251_s30 = smov [#allocation7]   ;;  %s172_s29 = int_to_ptr.vmem [resolvable:$true] %s171_s29 }
  0x13   : > { %s1545_s27 = scalar_select %p1347_p8, 1, 0 }
  0x14   : > { %p954_p10 = pneg %p1347_p8  ;;  %s181_s5 = sshll.u32 %s1251_s30, 4  ;;  %s182_s5 = int_to_ptr.vmem [resolvable:$true] %s181_s5 }
  0x15   : > { %s1252_s7 = smov [#allocation8]   ;;  %s1065_s9 = scalar_lea.vmem %s172_s29, 64 }
  0x16   : > { %p1356_p11 = pnand %p954_p10, %p1327_p1  ;;  %s194_s8 = sshll.u32 %s1252_s7, 4  ;;  %s195_s8 = int_to_ptr.vmem [resolvable:$true] %s194_s8 }
  0x17   : > { %p1066_p13 = scmp.ne.s32.totalorder %s172_s29, %s1065_s9  ;;  %p1073_p5 = scmp.lt.s32.totalorder %s172_s29, %s172_s29 }
  0x18   : > { %p1056_p12 = pneg %p1356_p11  ;;  %p1074_p7 = scmp.lt.s32.totalorder %s1065_s9, %s1065_s9 }
  0x1a   : > { %p1068_p0 = pnand %p1066_p13, %p1056_p12  ;;  %p1075_p9 = por %p1074_p7, %p1073_p5 }
  0x1c   : > { %p1069_p3 = pneg %p1068_p0 }
  0x1e   : > { %p1076_p10 = pnand %p1075_p9, %p1069_p3 }
  0x20   : > { %1079 = shalt.err (!%p1076_p10)
}
  0x21   : > { %957 = dma.hbm_to_vmem [thread:$0]  (!%p1356_p11), %s1533_s1, 64, %s172_s29, [#allocation6]  }
  0x22   : > { %s1091_s12 = scalar_lea.vmem %s182_s5, 128  ;;  %p1099_p13 = scmp.lt.s32.totalorder %s182_s5, %s182_s5 }
  0x23   : > { %p1092_p6 = scmp.ne.s32.totalorder %s182_s5, %s1091_s12  ;;  %p1100_p0 = scmp.lt.s32.totalorder %s1091_s12, %s1091_s12 }
  0x25   : > { %p1094_p1 = pnand %p1092_p6, %p1056_p12  ;;  %p1101_p8 = por %p1100_p0, %p1099_p13 }
  0x27   : > { %p1095_p4 = pneg %p1094_p1 }
  0x29   : > { %p1102_p2 = pnand %p1101_p8, %p1095_p4 }
  0x2b   : > { %1105 = shalt.err (!%p1102_p2)
}
  0x2c   : > { %s1253_s13 = smov 64   ;;  %s1254_s14 = smov 4  }
  0x2d   : > { %960 = dma.hbm_to_vmem [thread:$0]  (!%p1356_p11), %s1534_s2, 128, %s182_s5, [#allocation6], %s1253_s13, %s1253_s13, %s1254_s14  }
  0x2e   : > { %s1117_s28 = scalar_lea.vmem %s195_s8, 128  ;;  %p1125_p3 = scmp.lt.s32.totalorder %s195_s8, %s195_s8 }
  0x2f   : > { %p1118_p9 = scmp.ne.s32.totalorder %s195_s8, %s1117_s28  ;;  %p1126_p5 = scmp.lt.s32.totalorder %s1117_s28, %s1117_s28 }
  0x31   : > { %p1120_p1 = pnand %p1118_p9, %p1056_p12  ;;  %p1127_p4 = por %p1126_p5, %p1125_p3 }
  0x33   : > { %p1121_p6 = pneg %p1120_p1 }
  0x35   : > { %p1128_p2 = pnand %p1127_p4, %p1121_p6 }
  0x37   : > { %1131 = shalt.err (!%p1128_p2)
}
  0x38   : > { %963 = dma.hbm_to_vmem [thread:$0]  (!%p1356_p11), %s1535_s3, 128, %s195_s8, [#allocation9], %s1253_s13, %s1253_s13, %s1254_s14  }
  0x39   : > { %s43_s5 = sadd.s32 1, %s1236_s17  ;;  %s34_s7 = sadd.s32 1, %s1244_s19 }
  0x3a   : > { %p50_p8 = scmp.ne.s32.totalorder %s1236_s17, %s1232_s16  ;;  %p36_p12 = scmp.ge.s32.totalorder %s34_s7, 2 }
  0x3b   : > { %p51_p7 = scmp.eq.s32.totalorder %s1248_s20, 0  ;;  %p1547_p10 = scmp.ne.s32.totalorder %s1542_s24, 0 }
  0x3c   : > { %p975_p0 = scmp.lt.s32.totalorder %s1248_s20, 2  ;;  %s1561_s7 = smov (%p36_p12, %s34_s7), 0 }
  0x3d   : > { %p1393_p13 = por %p1547_p10, %p50_p8  ;;  %p52_p9 = por %p51_p7, %p50_p8 }
  0x3e   : > { %s208_s9 = sand.u32 1, %s1236_s17   ;;  %s38_s10 = ssub.s32 %s1244_s19, %s1561_s7 }
  0x3f   : > { %p41_p1 = scmp.eq.s32.totalorder %s38_s10, 0  ;;  %s876_s8 = sshll.u32 %s208_s9, 3 }
  0x40   : > { %s877_s11 = sshll.u32 %s1244_s19, 7  ;;  %s212_s21 = scalar_lea.vmem [#allocation2], %s876_s8 }
  0x41   : > { %s1405_s12 = scalar_select %p41_p1, %s1236_s17, %s43_s5  }
  0x42   : > { %s218_s24 = scalar_lea.hbm %s1532_s0, %s877_s11  ;;  %s220_s22 = sshll.u32 %s212_s21, 4  ;;  %s221_s22 = int_to_ptr.vmem [resolvable:$true] %s220_s22 }
  0x43   : > { %p1412_p11 = pnand %p975_p0, %p52_p9  ;;  %s209_s29 = scalar_lea.sflag [#allocation3], %s208_s9 }
  0x44   : > { %s1145_s30 = scalar_lea.vmem %s221_s22, 128  ;;  %s1255_s5 = smov [#allocation2]  }
  0x45   : > { %p1134_p6 = pneg %p1412_p11  ;;  %p1146_p3 = scmp.ne.s32.totalorder %s221_s22, %s1145_s30 }
  0x46   : > { %s1150_s10 = sshll.u32 %s1255_s5, 4  ;;  %s1151_s10 = int_to_ptr.vmem [resolvable:$false] %s1150_s10 }
  0x47   : > { %p1148_p5 = pnand %p1146_p3, %p1134_p6  ;;  %s1152_s11 = scalar_lea.vmem %s1151_s10, 256 }
  0x48   : > { %p1153_p2 = scmp.lt.s32.totalorder %s221_s22, %s1151_s10  ;;  %p1154_p8 = scmp.lt.s32.totalorder %s1152_s11, %s1145_s30 }
  0x49   : > { %p1149_p4 = pneg %p1148_p5 }
  0x4a   : > { %p1155_p12 = por %p1154_p8, %p1153_p2 }
  0x4c   : > { %p1156_p7 = pnand %p1155_p12, %p1149_p4 }
  0x4e   : > { %1159 = shalt.err (!%p1156_p7)
}
  0x4f   : > { %967 = dma.hbm_to_vmem [thread:$0]  (!%p1412_p11), %s218_s24, 128, %s221_s22, %s209_s29  }
  0x50   : > { %p1550_p10 = scmp.ne.s32.totalorder %s1545_s27, 0 }
  0x51   : > { %s1423_s9 = sand.u32 (!%p1550_p10), 1, %s1232_s16   ;;  %p1551_p0 = scmp.ne.s32.totalorder (!%p1550_p10), %s1543_s25, 0 }
  0x52   : > { %229 = sbr.rel (%p1550_p10) target bundleno = 661 (0x295), region = 36  ;;  %s879_s8 = sshll.u32 (!%p1550_p10), %s1423_s9, 3 }
  0x53   : > { %s232_s13 = scalar_lea.sflag (!%p1550_p10), [#allocation3], %s1423_s9  ;;  %s235_s14 = scalar_lea.vmem (!%p1550_p10), [#allocation2], %s879_s8 }
  0x57   : > { %1211 = dma.done.wait (%p1551_p0), %s232_s13, 128  }
  0x58   : > { %1213 = vsyncadd (%p1551_p0), %s232_s13, 4294967168  ;;  %p1552_p9 = scmp.ne.s32.totalorder %s1541_s23, 0 }
  0x5a   : > { %1215 = dma.done.wait (%p1552_p9), [#allocation6], 192  }
  0x5b   : > { %1217 = vsyncadd (%p1552_p9), [#allocation6], 4294967104 }
  0x5c   : > { %1219 = dma.done.wait (%p1552_p9), [#allocation9], 128  }
  0x5d   : > { %1221 = vsyncadd (%p1552_p9), [#allocation9], 4294967168  ;;  %v1256_v0 = vmov 1   ;;  %v273_v1 = vld [vmem:[%s235_s14] sm:$0xff]  ;;  %v1257_v2 = vmov 0   ;;  %v1258_v4 = vmov 2   ;;  %v312_v7 = vlaneseq }
  0x5e   : > { %1045 = vset.pattern.permute.xlu1 %v1256_v0  ;;  %274 = vxpose.xlu0.b32.start.end [1/1] (short) (narrow) %v273_v1, 8  ;;  %v1048_v5 = vld [vmem:[#allocation7] sm:$0xff]   ;;  %v1259_v6 = vmov 0.0   ;;  %vm1260_vm0 = vmmov 0   ;;  %v306_v11 = vld [vmem:[#allocation5] sm:$0x7] }
  0x5f   : > { %916 = vmatprep.subr.bf16.mxu1 %v1259_v6  ;;  %918 = vmatprep.mubr.msk.bf16.mxu1 %vm1260_vm0, %v1259_v6  ;;  %v313_v8 = vshrl.u32 %v312_v7, 7  ;;  %v1261_v34 = vmov 683565275   ;;  %v1262_v36 = vmov 2475754826   ;;  %s899_s23 = sshll.u32 %s1240_s18, 7 }
  0x60   : > { %917 = vmatpush3.bf16.msra.mxu1 %v1048_v5  ;;  %910 = vmatprep.subr.bf16.mxu0 %v1259_v6  ;;  %v1263_v39 = vmov 2131351028   ;;  %v1264_v42 = vmov 2102212464   ;;  %v1265_v45 = vmov 920167782   ;;  %s1484_s22 = scalar_lea.hbm %s1536_s4, %s899_s23 }
  0x61   : > { %911 = vmatpush3.bf16.msra.mxu0 %v1048_v5  ;;  %928 = vmatprep.subr.bf16.mxu1 %v1259_v6  ;;  %v323_v9 = vsub.s32 1, %v313_v8  ;;  %v314_v10 = vsub.s32 0, %v313_v8  ;;  %v333_v14 = vsub.s32 2, %v313_v8  ;;  %v1266_v48 = vmov 1326507024   ;;  %s271_s25 = scalar_lea.vmem [#allocation10], %s879_s8 }
  0x62   : > { %912 = vmatprep.mubr.msk.bf16.mxu0 %vm1260_vm0, %v1259_v6  ;;  %922 = vmatprep.subr.bf16.mxu0 %v1259_v6  ;;  %s760_s27 = sshll.u32 %s271_s25, 4  ;;  %s746_s18 = scalar_lea.sflag [#allocation4], %s1423_s9  ;;  %s1486_s27 = int_to_ptr.vmem [resolvable:$true] %s760_s27 }
  0x63   : > { %v324_v12 = vrot.slane %v306_v11, %v323_v9  ;;  %v315_v13 = vrot.slane %v306_v11, %v314_v10  ;;  %v334_v19 = vrot.slane %v306_v11, %v333_v14  ;;  %s1160_s28 = scalar_lea.vmem %s1486_s27, 128  ;;  %s1267_s29 = smov [#allocation10]  }
  0x64   : > { %p1161_p1 = scmp.ne.s32.totalorder %s1486_s27, %s1160_s28  ;;  %s1164_s30 = sshll.u32 %s1267_s29, 4  ;;  %s1165_s30 = int_to_ptr.vmem [resolvable:$false] %s1164_s30 }
  0x65   : > { %s1166_s5 = scalar_lea.vmem %s1165_s30, 256  ;;  %p1167_p3 = scmp.lt.s32.totalorder %s1486_s27, %s1165_s30 }
  0x66   : > { %p1162_p11 = pnand %p1161_p1, %p1393_p13  ;;  %p1168_p5 = scmp.lt.s32.totalorder %s1166_s5, %s1160_s28 }
  0x68   : > { %p1163_p6 = pneg %p1162_p11  ;;  %p1169_p4 = por %p1168_p5, %p1167_p3 }
  0x6a   : > { %p1170_p2 = pnand %p1169_p4, %p1163_p6 }
  0x87   : > { %1044 = vset.pattern.permute.xlu0 %v1257_v2 }
  0xda   : > { %v290_v3 = vpop.trf.xlu0 }
  0xdb   : > { %318 = vperm.xlu1 %1045, %v290_v3   ;;  %309 = vperm.xlu0 %1044, %v290_v3  }
  0xdf   : > { %1046 = vset.pattern.permute.xlu1 %v1258_v4  ;;  %1047 = vset.pattern.permute.xlu0 %v1258_v4 }
  0xe0   : > { %328 = vperm.xlu1 %1046, %v290_v3  }
 0x156   : > { %v319_v15 = vpop.permute.xlu1 %318  ;;  %v310_v16 = vpop.permute.xlu0 %309 }
 0x157   : > { %v325_v17 = vmul.f32 %v324_v12, %v319_v15  ;;  %v316_v18 = vmul.f32 %v315_v13, %v310_v16 }
 0x159   : > { %v326_v21 = vadd.f32 %v325_v17, %v316_v18 }
 0x15b   : > { %v329_v20 = vpop.permute.xlu1 %328 }
 0x15c   : > { %v335_v22 = vmul.f32 %v334_v19, %v329_v20 }
 0x15e   : > { %v1449_v23 = vadd.f32 %v335_v22, %v326_v21 }
 0x160   : > { %v340_v24 = vand.u32 2139095040, %v1449_v23  ;;  %v337_v28 = vand.u32 2147483647, %v1449_v23  ;;  %vm339_vm8 = vcmp.lt.s32.totalorder %v1449_v23, 0 }
 0x162   : > { %v341_v25 = vshrl.u32 %v340_v24, 23  ;;  %v344_v31 = vand.u32 8388607, %v337_v28  ;;  %vm338_vm9 = vcmp.le.f32.partialorder %v337_v28, 0.7853982 }
 0x164   : > { %v884_v26 = vadd.s32 4294967169, %v341_v25  ;;  %v345_v50 = vor.u32 8388608, %v344_v31 }
 0x166   : > { %v347_v27 = vadd.s32 1, %v884_v26  ;;  %v385_v0 = vshll.u32 %v345_v50, 8 }
 0x168   : > { %vm348_vm1 = vcmp.gt.s32.totalorder %v347_v27, 0 }
 0x169   : > { %v349_v29 = vsel %vm348_vm1, %v347_v27, 0  ;;  %vm429_vm1 = vweird.f32 %v1449_v23 }
 0x16a   : > { %v351_v30 = vand.u32 31, %v349_v29  ;;  %v350_v33 = vshrl.u32 %v349_v29, 5 }
 0x16c   : > { %v352_v32 = vsub.s32 32, %v351_v30  ;;  %v354_v35 = vshll.u32 %v1261_v34, %v351_v30  ;;  %v357_v37 = vshll.u32 %v1262_v36, %v351_v30  ;;  %v360_v41 = vshll.u32 %v1263_v39, %v351_v30 }
 0x16d   : > { %v363_v44 = vshll.u32 %v1264_v42, %v351_v30  ;;  %v366_v47 = vshll.u32 %v1265_v45, %v351_v30  ;;  %vm369_vm2 = vcmp.lt.s32.totalorder %v350_v33, 1  ;;  %vm372_vm3 = vcmp.lt.s32.totalorder %v350_v33, 4 }
 0x16e   : > { %v355_v38 = vshrl.u32 %v1262_v36, %v352_v32  ;;  %v358_v40 = vshrl.u32 %v1263_v39, %v352_v32  ;;  %v361_v43 = vshrl.u32 %v1264_v42, %v352_v32  ;;  %v364_v46 = vshrl.u32 %v1265_v45, %v352_v32 }
 0x16f   : > { %v367_v49 = vshrl.u32 %v1266_v48, %v352_v32  ;;  %v353_v59 = vshrl.u32 %v1261_v34, %v352_v32  ;;  %vm371_vm4 = vcmp.lt.s32.totalorder %v350_v33, 3  ;;  %vm370_vm5 = vcmp.lt.s32.totalorder %v350_v33, 2 }
 0x170   : > { %v356_v51 = vor.u32 %v355_v38, %v354_v35  ;;  %v359_v52 = vor.u32 %v358_v40, %v357_v37  ;;  %v362_v53 = vor.u32 %v361_v43, %v360_v41  ;;  %v365_v54 = vor.u32 %v364_v46, %v363_v44 }
 0x171   : > { %v368_v55 = vor.u32 %v367_v49, %v366_v47 }
 0x172   : > { %v374_v56 = vsel %vm372_vm3, %v362_v53, 2102212464  ;;  %v377_v57 = vsel %vm369_vm2, %v356_v51, %v359_v52  ;;  %v381_v58 = vsel %vm369_vm2, %v359_v52, %v362_v53  ;;  %v378_v60 = vsel %vm372_vm3, %v365_v54, 920167782 }
 0x173   : > { %v382_v61 = vsel %vm372_vm3, %v368_v55, 1326507024  ;;  %v379_v62 = vsel %vm371_vm4, %v362_v53, %v378_v60  ;;  %v373_v1 = vsel %vm369_vm2, %v353_v59, %v356_v51  ;;  %v375_v2 = vsel %vm371_vm4, %v359_v52, %v374_v56 }
 0x174   : > { %v383_v63 = vsel %vm371_vm4, %v365_v54, %v382_v61  ;;  %v380_v3 = vsel %vm370_vm5, %v377_v57, %v379_v62  ;;  %v376_v10 = vsel %vm370_vm5, %v373_v1, %v375_v2  ;;  %vm562_vm2 = vcmask 130048  }
 0x175   : > { %v384_v4 = vsel %vm370_vm5, %v381_v58, %v383_v63  ;;  %v1458_v8 = vmul.u32.u64.low %v385_v0, %v380_v3  ;;  %v1459_v9 = vmul.u32.u64.high %v385_v0, %v380_v3, %v1458_v8  ;;  %v392_v12 = vmul.u32 %v385_v0, %v376_v10  ;;  %v1049_v58 = vld [vmem:[#allocation8] sm:$0xff]  }
 0x176   : > { %v1455_v5 = vmul.u32.u64.low %v385_v0, %v384_v4  ;;  %v1456_v7 = vmul.u32.u64.high %v385_v0, %v384_v4, %v1455_v5 }
 0x177   : > { %v395_v11 = vadd.s32 1, %v1459_v9 }
 0x178   : > { %vm394_vm6 = vc.u32 %v1456_v7, %v1458_v8  ;;  %v393_v25 = vadd.s32 %v1458_v8, %v1456_v7 }
 0x179   : > { %v396_v13 = vsel %vm394_vm6, %v395_v11, %v1459_v9 }
 0x17a   : > { %v397_v14 = vadd.s32 %v396_v13, %v392_v12 }
 0x17c   : > { %v398_v15 = vadd.s32 536870912, %v397_v14 }
 0x17e   : > { %v399_v16 = vshrl.u32 %v398_v15, 30 }
 0x180   : > { %v400_v17 = vshll.u32 %v399_v16, 30  ;;  %v423_v39 = vsub.s32 4, %v399_v16 }
 0x182   : > { %v401_v18 = vsub.s32 %v397_v14, %v400_v17  ;;  %v424_v42 = vsel %vm339_vm8, %v423_v39, %v399_v16 }
 0x183   : > { %v426_v43 = vsel %vm338_vm9, 0, %v424_v42 }
 0x184   : > { %v403_v19 = vsub.s32 0, %v401_v18  ;;  %v533_v44 = vadd.s32 3, %v426_v43  ;;  %v430_v45 = vand.u32 3, %v426_v43 }
 0x186   : > { %v885_v20 = vmin.u32 %v403_v19, %v401_v18  ;;  %v534_v46 = vand.u32 3, %v533_v44  ;;  %vm435_vm10 = vcmp.eq.s32.totalorder %v430_v45, 2  ;;  %vm432_vm12 = vcmp.eq.s32.totalorder %v430_v45, 0 }
 0x187   : > { %vm431_vm14 = vcmp.lt.s32.totalorder %v430_v45, 2 }
 0x188   : > { %v405_v21 = vclz %v885_v20  ;;  %vm539_vm11 = vcmp.eq.s32.totalorder %v534_v46, 2  ;;  %vm536_vm13 = vcmp.eq.s32.totalorder %v534_v46, 0  ;;  %vm535_vm15 = vcmp.lt.s32.totalorder %v534_v46, 2 }
 0x18a   : > { %v886_v22 = vadd.s32 4294967294, %v405_v21 }
 0x18c   : > { %vm887_vm7 = vcmp.lt.s32.totalorder %v886_v22, 0 }
 0x18d   : > { %v408_v24 = vsel %vm887_vm7, 0, %v886_v22 }
 0x18e   : > { %v409_v26 = vsub.s32 32, %v408_v24  ;;  %v413_v27 = vsub.s32 4294967266, %v408_v24  ;;  %v410_v29 = vshll.u32 %v401_v18, %v408_v24 }
 0x190   : > { %v411_v30 = vshrl.u32 %v393_v25, %v409_v26  ;;  %v414_v31 = vadd.s32 127, %v413_v27 }
 0x192   : > { %v412_v32 = vor.u32 %v411_v30, %v410_v29  ;;  %v415_v33 = vshll.u32 %v414_v31, 23 }
 0x194   : > { %v416_v34 = vor.u32 4788187, %v415_v33  ;;  %v419_v36 = vcvt.s32.f32 %v412_v32 }
 0x196   : > { %v417_v35 = vand.u32 2147483647, %v416_v34 }
 0x198   : > { %v420_v37 = vmul.f32 %v419_v36, %v417_v35 }
 0x19a   : > { %v421_v38 = vxor.u32 2147483648, %v420_v37 }
 0x19c   : > { %v422_v40 = vsel %vm339_vm8, %v421_v38, %v420_v37 }
 0x19d   : > { %v425_v41 = vsel %vm338_vm9, %v1449_v23, %v422_v40 }
 0x19e   : > { %1050 = vcosq.f32 %v425_v41 }
 0x19f   : > { %1052 = vsinq.f32 %v425_v41 }
 0x1ab   : > { %v1051_v47 = vpop.eup %1050 }
 0x1ac   : > { %v1053_v48 = vpop.eup %1052  ;;  %v436_v49 = vxor.u32 2147483648, %v1051_v47 }
 0x1ad   : > { %v433_v50 = vxor.u32 2147483648, %v1053_v48 }
 0x1ae   : > { %v437_v51 = vsel %vm435_vm10, %v436_v49, %v1053_v48  ;;  %v541_v28 = vsel %vm539_vm11, %v436_v49, %v1053_v48 }
 0x1af   : > { %v434_v52 = vsel %vm432_vm12, %v1051_v47, %v433_v50  ;;  %v538_v53 = vsel %vm536_vm13, %v1051_v47, %v433_v50 }
 0x1b0   : > { %v438_v54 = vsel %vm431_vm14, %v434_v52, %v437_v51  ;;  %v542_v55 = vsel %vm535_vm15, %v538_v53, %v541_v28 }
 0x1b1   : > { %v439_v56 = vsel %vm429_vm1, nan, %v438_v54  ;;  %v543_v57 = vsel %vm429_vm1, nan, %v542_v55 }
 0x1b2   : > { %v544_v59 = vpack.c.bf16 %v439_v56, %v439_v56  ;;  %v548_v60 = vpack.c.bf16 %v543_v57, %v543_v57 }
 0x1b4   : > { %v545_v61 = vunpack.c.l.bf16 %v544_v59  ;;  %v549_v62 = vunpack.c.l.bf16 %v548_v60  ;;  %919 = vmatmul.mubr.msk.bf16.vlgmr.msra.gmra.mxu1 %vm562_vm2, %v544_v59 }
 0x1b5   : > { %929 = vmatpush3.bf16.msra.mxu1 %v1049_v58  ;;  %930 = vmatprep.mubr.msk.bf16.mxu1 %vm1260_vm0, %v1259_v6 }
 0x1b6   : > { %v550_v63 = vsub.f32 %v543_v57, %v549_v62  ;;  %v546_v0 = vsub.f32 %v439_v56, %v545_v61 }
 0x1b8   : > { %v547_v1 = vpack.c.bf16 %v546_v0, %v546_v0  ;;  %v551_v23 = vpack.c.bf16 %v550_v63, %v550_v63 }
 0x1ba   : > { %913 = vmatmul.mubr.msk.bf16.vlgmr.msra.gmra.mxu0 %vm562_vm2, %v547_v1 }
 0x1bb   : > { %923 = vmatpush3.bf16.msra.mxu0 %v1049_v58  ;;  %924 = vmatprep.mubr.msk.bf16.mxu0 %vm1260_vm0, %v1259_v6  ;;  %vm743_vm0 = vcmask 523264  }
 0x1bc   : > { %931 = vmatmul.mubr.msk.bf16.vlgmr.msra.gmra.mxu1 %vm562_vm2, %v551_v23 }
 0x1c2   : > { %925 = vmatmul.mubr.msk.bf16.vlgmr.msra.gmra.mxu0 %vm562_vm2, %v548_v60 }
 0x274   : > { %v643_v2 = vpop.f32.mrf.mxu1 }
 0x276   : > { %v920_v3 = vpop.f32.mrf.mxu1 }
 0x278   : > { %v646_v4 = vpop.f32.mrf.mxu1 }
 0x27a   : > { %v600_v5 = vpop.f32.mrf.mxu0  ;;  %v921_v7 = vpop.f32.mrf.mxu1 }
 0x27b   : > { %v644_v14 = vadd.f32 %v643_v2, %v600_v5 }
 0x27c   : > { %v914_v8 = vpop.f32.mrf.mxu0  ;;  %v736_v9 = vpop.f32.mrf.mxu1 }
 0x27e   : > { %v603_v10 = vpop.f32.mrf.mxu0  ;;  %v932_v11 = vpop.f32.mrf.mxu1 }
 0x280   : > { %v915_v12 = vpop.f32.mrf.mxu0  ;;  %v739_v13 = vpop.f32.mrf.mxu1 }
 0x282   : > { %v692_v6 = vpop.f32.mrf.mxu0  ;;  %v933_v15 = vpop.f32.mrf.mxu1 }
 0x283   : > { %v698_v16 = vadd.f32 %v692_v6, %v644_v14 }
 0x284   : > { %v926_v17 = vpop.f32.mrf.mxu0 }
 0x285   : > { %v742_v18 = vadd.f32 %v736_v9, %v698_v16 }
 0x286   : > { %v695_v19 = vpop.f32.mrf.mxu0 }
 0x287   : > { %744 = vst.msk [vmem:[%s271_s25] sm:$0xff] %vm743_vm0, %v742_v18 }
 0x288   : > { %v927_v20 = vpop.f32.mrf.mxu0 }
 0x289   : > { %1173 = shalt.err (!%p1170_p2)
}
 0x28a   : > { %s1174_s10 = scalar_lea.hbm %s1484_s22, 128  ;;  %s1178_s8 = scalar_lea.hbm %s1536_s4, 256 }
 0x28b   : > { %p1175_p8 = scmp.ne.s32.totalorder %s1484_s22, %s1174_s10  ;;  %p1179_p10 = scmp.lt.s32.totalorder %s1484_s22, %s1536_s4 }
 0x28c   : > { %p1180_p0 = scmp.lt.s32.totalorder %s1178_s8, %s1174_s10 }
 0x28d   : > { %p1176_p12 = pnand %p1175_p8, %p1393_p13 }
 0x28e   : > { %p1181_p9 = por %p1180_p0, %p1179_p10 }
 0x28f   : > { %p1177_p7 = pneg %p1176_p12 }
 0x291   : > { %p1182_p1 = pnand %p1181_p9, %p1177_p7 }
 0x293   : > { %1185 = shalt.err (!%p1182_p1)
}
 0x294   : > { %952 = dma.vmem_to_hbm [thread:$0]  (%p1393_p13), %s1486_s27, 128, %s1484_s22, %s746_s18  }
 0x295 PF: > { %s772_s23 = sand.u32 1, %s1228_s15   ;;  %p1553_p11 = scmp.ne.s32.totalorder %s1544_s26, 0 }
 0x296   : > { %p1554_p6 = scmp.ge.s32.totalorder %s1248_s20, 2  ;;  %s773_s25 = scalar_lea.sflag [#allocation4], %s772_s23 }
 0x298   : > { %p969_p3 = pnand %p1554_p6, %p1553_p11 }
 0x29a   : > { %p970_p5 = pneg %p969_p3 }
 0x29c   : > { %1223 = dma.done.wait (%p970_p5), %s773_s25, 128  }
 0x29d   : > { %1225 = vsyncadd (%p970_p5), %s773_s25, 4294967168  ;;  %s22_s20 = sadd.s32 1, %s1248_s20   ;;  %s1555_s15 = smov %s1232_s16 }
 0x29e   : > { %p19_p4 = scmp.ge.s32.totalorder %s22_s20, 4   ;;  %s1556_s16 = smov %s1236_s17 }
 0x29f   : > { %s1557_s17 = smov %s1405_s12  ;;  %s1558_s18 = smov %s1244_s19 }
 0x2a0   : > { %s1559_s19 = smov %s1561_s7  ;;  %21 = sbr.rel (!%p19_p4) target bundleno = 8 (0x8), region = 93 }
 0x2a5   :  { %778 = vsyncpa [#allocation3], 1 }
 0x2a6   :  { %780 = vsyncpa [#allocation3 + $0x1], 1 }
 0x2a7   :  { %781 = vsyncpa [#allocation6], 1 }
 0x2a8   :  { %782 = vsyncpa [#allocation9], 1 }
 0x2a9   :  { %783 = vsyncpa [#allocation4], 1 }
 0x2aa   :  { %785 = vsyncpa [#allocation4 + $0x1], 1 }

</bundles_post_ra>
